<compile_context>
chip_gen: v7x
topology: tpu7x:2x2x1
jax: 0.10.0
libtpu: 0.0.40
codegen_flags: <defaults>
</compile_context>

<pallas_src>
import functools

import jax
import jax.numpy as jnp
from jax import lax
from jax.experimental import pallas as pl
from jax.experimental.pallas import tpu as pltpu


def snake_relu_net_kernel(x_ref, vecs_ref, w2_ref, w3_ref, b3_ref, o_ref, *, chunk):
    """One batch tile, batch on the lane axis.

    Per-tile shapes:
      x_ref    (1, TB)   batch on lanes (lane-dense)
      vecs_ref (H, 8)    columns: [w1, b1, a, 1/a, b2, 0, 0, 0]
      w2_ref   (H, H)    fc2 weight, (out, in)
      w3_ref   (OP, H)   fc3 weight, (out_pad8, in)
      b3_ref   (OP, 1)
      o_ref    (OP, TB)
    """
    tb = o_ref.shape[1]
    num_chunks = tb // chunk

    def body(c, carry):
        off = pl.multiple_of(c * chunk, chunk)
        xc = x_ref[:, pl.ds(off, chunk)]           # (1, C)

        w1 = vecs_ref[:, 0:1]                      # (H, 1), broadcast over lanes
        b1 = vecs_ref[:, 1:2]
        a = vecs_ref[:, 2:3]
        inv_a = vecs_ref[:, 3:4]
        b2 = vecs_ref[:, 4:5]

        # fc1 (in_features == 1): rank-1 outer product on the VPU.
        h = w1 * xc + b1                           # (H, C)

        # Snake: x + (1/a) * sin(a*x)^2  (a != 0 assumed; 1/a precomputed).
        s = jnp.sin(h * a)
        h = h + inv_a * (s * s)

        # fc2 + ReLU (f32 MXU, batch streams through the N dimension).
        h2 = jnp.dot(w2_ref[...], h, preferred_element_type=jnp.float32) + b2
        h2 = jnp.maximum(h2, 0.0)

        # fc3: (OP, H) @ (H, C) + (OP, 1). Lane-dense store (no masked vst).
        o = jnp.dot(w3_ref[...], h2, preferred_element_type=jnp.float32) + b3_ref[...]
        o_ref[:, pl.ds(off, chunk)] = o.astype(o_ref.dtype)
        return carry

    lax.fori_loop(0, num_chunks, body, None, unroll=True)


def snake_relu_net_tn(x_row, params, *, block_batch=2048, out_dtype=jnp.float32):
    """Fast path, batch-on-lanes.

    x_row: (1, N) f32 (batch on the lane axis). Returns (n_out_pad8, n_pad)
    where n_pad rounds N up to the batch tile. No post-kernel slice: padded
    rows/lanes are the caller's to ignore (they are finite, derived from zero
    inputs / zero weight rows).
    """
    assert x_row.ndim == 2 and x_row.shape[0] == 1
    n = x_row.shape[1]
    n_out = params["w3"].shape[1]
    n_out_pad = max(8, ((n_out + 7) // 8) * 8)

    # Per-feature column vectors packed into one (H, 8) array: one small DMA
    # buffer instead of five. NOTE: standard Snake assumes a != 0 (the a->0
    # identity limit is not handled because 1/a is precomputed here).
    a = params["a"]
    cols = jnp.concatenate(
        [params["w1"].T, params["b1"].T, a.T, (1.0 / a).T, params["b2"].T], axis=1)
    vecs = jnp.pad(cols, ((0, 0), (0, 8 - cols.shape[1])))            # (H, 8)

    # Weights in (out, in) orientation so the kernel computes W @ h.
    w2t = params["w2"].T                                              # (H, H)
    w3t = jnp.pad(params["w3"].T, ((0, n_out_pad - n_out), (0, 0)))   # (OP, H)
    b3 = jnp.pad(params["b3"].T, ((0, n_out_pad - n_out), (0, 0)))    # (OP, 1)

    # Batch tiling: lane axis in multiples of 128; big tiles amortize per-step
    # pipeline overhead, the in-kernel chunk loop bounds vreg pressure.
    n_lane = ((n + 127) // 128) * 128
    tb = min(((block_batch + 127) // 128) * 128, n_lane)
    n_pad = ((n_lane + tb - 1) // tb) * tb
    x_p = jnp.pad(x_row, ((0, 0), (0, n_pad - n)))

    chunk = 256 if tb % 256 == 0 else 128

    const = lambda i: (0, 0)   # same block every step -> DMA'd once, VMEM-resident
    return pl.pallas_call(
        functools.partial(snake_relu_net_kernel, chunk=chunk),
        out_shape=jax.ShapeDtypeStruct((n_out_pad, n_pad), out_dtype),
        grid=(n_pad // tb,),
        in_specs=[
            pl.BlockSpec((1, tb), lambda i: (0, i)),   # x: batch on lanes
            pl.BlockSpec(vecs.shape, const),
            pl.BlockSpec(w2t.shape, const),
            pl.BlockSpec(w3t.shape, const),
            pl.BlockSpec(b3.shape, const),
        ],
        out_specs=pl.BlockSpec((n_out_pad, tb), lambda i: (0, i)),
        compiler_params=pltpu.CompilerParams(
            dimension_semantics=("parallel",)),        # megacore sharding on v7x
    )(x_p, vecs, w2t, w3t, b3)


def snake_relu_net(x, params, *, block_batch=2048, out_dtype=jnp.float32):
    """Convenience API matching the PyTorch module: x (N, 1) -> (N, n_out).

    The transpose/slice back to batch-major happens outside the kernel; callers
    that can consume the batch-on-lanes layout should call snake_relu_net_tn
    directly and skip this relayout entirely.
    """
    n = x.shape[0]
    n_out = params["w3"].shape[1]
    out_tn = snake_relu_net_tn(x.T, params, block_batch=block_batch,
                               out_dtype=out_dtype)
    return out_tn[:n_out, :n].T


def init_params(key, n_hidden, n_out, alpha):
    """Deterministic synthetic init matching the PyTorch module's shapes.

    Weights stored [in, out] (transposed from torch's Linear), biases (1, feat).
    """
    assert alpha != 0.0, "Snake parameter a must be nonzero (1/a is precomputed)"
    k1, k2, k3, k4, k5, k6 = jax.random.split(key, 6)
    # fc1: Linear(1, H)
    w1 = jax.random.uniform(k1, (1, n_hidden), jnp.float32, -1.0, 1.0)
    b1 = jax.random.uniform(k2, (1, n_hidden), jnp.float32, -1.0, 1.0)
    # Snake a = alpha * ones(H)
    a = jnp.full((1, n_hidden), alpha, dtype=jnp.float32)
    # fc2: Linear(H, H)
    lim2 = 1.0 / jnp.sqrt(jnp.float32(n_hidden))
    w2 = jax.random.uniform(k3, (n_hidden, n_hidden), jnp.float32, -lim2, lim2)
    b2 = jax.random.uniform(k4, (1, n_hidden), jnp.float32, -lim2, lim2)
    # fc3: Linear(H, n_out)
    w3 = jax.random.uniform(k5, (n_hidden, n_out), jnp.float32, -lim2, lim2)
    b3 = jax.random.uniform(k6, (1, n_out), jnp.float32, -lim2, lim2)
    return dict(w1=w1, b1=b1, a=a, w2=w2, b2=b2, w3=w3, b3=b3)


def reference_forward(x, p):
    h = x @ p["w1"] + p["b1"]
    h = h + (1.0 / p["a"]) * jnp.sin(h * p["a"]) ** 2
    h = jnp.maximum(h @ p["w2"] + p["b2"], 0.0)
    return h @ p["w3"] + p["b3"]


if __name__ == "__main__":
    key = jax.random.PRNGKey(0)
    k_in, k_par, k_in2 = jax.random.split(key, 3)

    batch, n_hidden, n_out, alpha = 8, 32, 4, 0.5
    x = jax.random.normal(k_in, (batch, 1), dtype=jnp.float32)
    params = init_params(k_par, n_hidden, n_out, alpha)

    ref = reference_forward(x, params)
    out = jax.block_until_ready(snake_relu_net(x, params))
    assert out.shape == (batch, n_out)
    assert jnp.allclose(out, ref, atol=1e-5, rtol=1e-5), "f32 mismatch vs reference"

    # Non-128-multiple batch: exercises lane padding + multi-chunk inner loop.
    batch2 = 300
    x2 = jax.random.normal(k_in2, (batch2, 1), dtype=jnp.float32)
    ref2 = reference_forward(x2, params)
    out2 = jax.block_until_ready(snake_relu_net(x2, params))
    assert out2.shape == (batch2, n_out)
    assert jnp.allclose(out2, ref2, atol=1e-5, rtol=1e-5), "f32 mismatch (batch=300)"

    # Optional bf16 *output* stream (halves HBM write traffic); math stays f32.
    out_bf16 = jax.block_until_ready(
        snake_relu_net(x, params, out_dtype=jnp.bfloat16))
    assert out_bf16.shape == (batch, n_out)
    assert jnp.allclose(out_bf16.astype(jnp.float32), ref, atol=2e-2, rtol=2e-2), \
        "bf16-output mismatch vs reference"

    print("KERNEL_OK")
</pallas_src>

<mosaic_0001>
module attributes {stable_mosaic.version = 11 : i64} {
  func.func @snake_relu_net_kernel(%arg0: i32, %arg1: memref<1x128xf32, #tpu.memory_space<vmem>>, %arg2: memref<32x8xf32, #tpu.memory_space<vmem>>, %arg3: memref<32x32xf32, #tpu.memory_space<vmem>>, %arg4: memref<8x32xf32, #tpu.memory_space<vmem>>, %arg5: memref<8x1xf32, #tpu.memory_space<vmem>>, %arg6: memref<8x128xf32, #tpu.memory_space<vmem>>) attributes {dimension_semantics = [#tpu.dimension_semantics<parallel>], iteration_bounds = array<i64: 1>, scalar_prefetch = 0 : i64, scratch_operands = 0 : i64, tpu.core_type = #tpu.core_type<tc>, window_params = [{transform_indices = @transform_0, window_bounds = array<i64: 1, 128>}, {pipeline_mode = #tpu.pipeline_mode<synchronous>, transform_indices = @transform_1, window_bounds = array<i64: 32, 8>}, {pipeline_mode = #tpu.pipeline_mode<synchronous>, transform_indices = @transform_2, window_bounds = array<i64: 32, 32>}, {pipeline_mode = #tpu.pipeline_mode<synchronous>, transform_indices = @transform_3, window_bounds = array<i64: 8, 32>}, {pipeline_mode = #tpu.pipeline_mode<synchronous>, transform_indices = @transform_4, window_bounds = array<i64: 8, 1>}, {transform_indices = @transform_5, window_bounds = array<i64: 8, 128>}]} {
    %c0_i32 = arith.constant 0 : i32
    %c128_i32 = arith.constant 128 : i32
    %0 = arith.muli %c0_i32, %c128_i32 : i32
    %1 = tpu.assume_multiple %0, 128 : i32
    %c0 = arith.constant 0 : index
    %2 = arith.index_cast %1 : i32 to index
    %3 = vector.load %arg1[%c0, %2] : memref<1x128xf32, #tpu.memory_space<vmem>>, vector<1x128xf32>
    %c0_0 = arith.constant 0 : index
    %c0_1 = arith.constant 0 : index
    %4 = vector.load %arg2[%c0_0, %c0_1] : memref<32x8xf32, #tpu.memory_space<vmem>>, vector<32x1xf32>
    %c0_2 = arith.constant 0 : index
    %c1 = arith.constant 1 : index
    %5 = vector.load %arg2[%c0_2, %c1] : memref<32x8xf32, #tpu.memory_space<vmem>>, vector<32x1xf32>
    %c0_3 = arith.constant 0 : index
    %c2 = arith.constant 2 : index
    %6 = vector.load %arg2[%c0_3, %c2] : memref<32x8xf32, #tpu.memory_space<vmem>>, vector<32x1xf32>
    %c0_4 = arith.constant 0 : index
    %c3 = arith.constant 3 : index
    %7 = vector.load %arg2[%c0_4, %c3] : memref<32x8xf32, #tpu.memory_space<vmem>>, vector<32x1xf32>
    %c0_5 = arith.constant 0 : index
    %c4 = arith.constant 4 : index
    %8 = vector.load %arg2[%c0_5, %c4] : memref<32x8xf32, #tpu.memory_space<vmem>>, vector<32x1xf32>
    %9 = vector.broadcast %4 : vector<32x1xf32> to vector<32x128xf32>
    %10 = vector.broadcast %3 : vector<1x128xf32> to vector<32x128xf32>
    %11 = arith.mulf %9, %10 : vector<32x128xf32>
    %12 = vector.broadcast %5 : vector<32x1xf32> to vector<32x128xf32>
    %13 = arith.addf %11, %12 : vector<32x128xf32>
    %14 = vector.broadcast %6 : vector<32x1xf32> to vector<32x128xf32>
    %15 = arith.mulf %13, %14 : vector<32x128xf32>
    %16 = math.sin %15 : vector<32x128xf32>
    %17 = arith.mulf %16, %16 : vector<32x128xf32>
    %18 = vector.broadcast %7 : vector<32x1xf32> to vector<32x128xf32>
    %19 = arith.mulf %18, %17 : vector<32x128xf32>
    %20 = arith.addf %13, %19 : vector<32x128xf32>
    %c0_6 = arith.constant 0 : index
    %c0_7 = arith.constant 0 : index
    %21 = vector.load %arg3[%c0_6, %c0_7] : memref<32x32xf32, #tpu.memory_space<vmem>>, vector<32x32xf32>
    %cst = arith.constant dense<0.000000e+00> : vector<32x128xf32>
    %22 = tpu.matmul %21, %20, %cst {dimension_numbers = #tpu.dot_dimension_numbers<[1], [0], [0], [1], [0, 0, 1, 1], [], []>} : vector<32x32xf32>, vector<32x128xf32>, vector<32x128xf32> -> vector<32x128xf32>
    %23 = vector.broadcast %8 : vector<32x1xf32> to vector<32x128xf32>
    %24 = arith.addf %22, %23 : vector<32x128xf32>
    %cst_8 = arith.constant 0.000000e+00 : f32
    %25 = vector.broadcast %cst_8 : f32 to vector<32x128xf32>
    %26 = arith.maximumf %24, %25 : vector<32x128xf32>
    %c0_9 = arith.constant 0 : index
    %c0_10 = arith.constant 0 : index
    %27 = vector.load %arg4[%c0_9, %c0_10] : memref<8x32xf32, #tpu.memory_space<vmem>>, vector<8x32xf32>
    %cst_11 = arith.constant dense<0.000000e+00> : vector<8x128xf32>
    %28 = tpu.matmul %27, %26, %cst_11 {dimension_numbers = #tpu.dot_dimension_numbers<[1], [0], [0], [1], [0, 0, 1, 1], [], []>} : vector<8x32xf32>, vector<32x128xf32>, vector<8x128xf32> -> vector<8x128xf32>
    %c0_12 = arith.constant 0 : index
    %c0_13 = arith.constant 0 : index
    %29 = vector.load %arg5[%c0_12, %c0_13] : memref<8x1xf32, #tpu.memory_space<vmem>>, vector<8x1xf32>
    %30 = vector.broadcast %29 : vector<8x1xf32> to vector<8x128xf32>
    %31 = arith.addf %28, %30 : vector<8x128xf32>
    %c0_14 = arith.constant 0 : index
    %32 = arith.index_cast %1 : i32 to index
    %33 = vector.load %arg6[%c0_14, %32] : memref<8x128xf32, #tpu.memory_space<vmem>>, vector<8x128xf32>
    tpu.vector_store %arg6[%c0_14, %32], %31 {strides = array<i32>} : memref<8x128xf32, #tpu.memory_space<vmem>>, vector<8x128xf32>,
    %c1_i32 = arith.constant 1 : i32
    return
  }
  func.func @transform_0(%arg0: i32) -> (i32, i32) {
    %c0_i32 = arith.constant 0 : i32
    %c0_i32_0 = arith.constant 0 : i32
    return %c0_i32, %arg0 : i32, i32
  }
  func.func @transform_1(%arg0: i32) -> (i32, i32) {
    %c0_i32 = arith.constant 0 : i32
    %c0_i32_0 = arith.constant 0 : i32
    %c0_i32_1 = arith.constant 0 : i32
    return %c0_i32, %c0_i32_0 : i32, i32
  }
  func.func @transform_2(%arg0: i32) -> (i32, i32) {
    %c0_i32 = arith.constant 0 : i32
    %c0_i32_0 = arith.constant 0 : i32
    %c0_i32_1 = arith.constant 0 : i32
    return %c0_i32, %c0_i32_0 : i32, i32
  }
  func.func @transform_3(%arg0: i32) -> (i32, i32) {
    %c0_i32 = arith.constant 0 : i32
    %c0_i32_0 = arith.constant 0 : i32
    %c0_i32_1 = arith.constant 0 : i32
    return %c0_i32, %c0_i32_0 : i32, i32
  }
  func.func @transform_4(%arg0: i32) -> (i32, i32) {
    %c0_i32 = arith.constant 0 : i32
    %c0_i32_0 = arith.constant 0 : i32
    %c0_i32_1 = arith.constant 0 : i32
    return %c0_i32, %c0_i32_0 : i32, i32
  }
  func.func @transform_5(%arg0: i32) -> (i32, i32) {
    %c0_i32 = arith.constant 0 : i32
    %c0_i32_0 = arith.constant 0 : i32
    return %c0_i32, %arg0 : i32, i32
  }
}

</mosaic_0001>

<bundles_post_ra>
// kernel: tpu_custom_call.1
= control target key start
LH: loop header
LB: loop body
LE: loop exit
PB: predicated region body
PF: predicated region fallthrough
CT: control target
= control target key end

     0   :  { %v915_v1 = vmov 1   ;;  %v916_v2 = vmov 0   ;;  %s1328_s0 = inlined_call_operand.vmem [shape: f32[1,128], index: 0, kind: input, shape index: {}]   ;;  %s1329_s1 = inlined_call_operand.vmem [shape: f32[32,8], index: 1, kind: input, shape index: {}]   ;;  %s1330_s2 = inlined_call_operand.vmem [shape: f32[32,32], index: 2, kind: input, shape index: {}]   ;;  %s1331_s3 = inlined_call_operand.vmem [shape: f32[8,32], index: 3, kind: input, shape index: {}]   ;;  %s1332_s4 = inlined_call_operand.vmem [shape: f32[8,1], index: 4, kind: input, shape index: {}]   ;;  %s1333_s5 = inlined_call_operand.hbm [shape: f32[8,128], index: 5, kind: output, shape index: {}]  }
   0x1   :  { %v963_v0 = vld [vmem:[%s1329_s1] sm:$0xff]  ;;  %863 = vset.pattern.permute.xlu1 %v915_v1  ;;  %862 = vset.pattern.permute.xlu0 %v916_v2 }
   0x2   :  { %10 = vsyncpa [#allocation3], 0  ;;  %57 = vperm.xlu1 %863, %v963_v0   ;;  %28 = vperm.xlu0 %862, %v963_v0   ;;  %v971_v3 = vld [vmem:[%s1329_s1 + $0x8] sm:$0xff]  ;;  %v978_v4 = vld [vmem:[%s1329_s1 + $0x10] sm:$0xff]  ;;  %v917_v6 = vmov 2   ;;  %v918_v7 = vmov 3  }
   0x3   :  { %v983_v5 = vld [vmem:[%s1329_s1 + $0x18] sm:$0xff]  ;;  %v757_v12 = vld [vmem:[%s1328_s0] ss:$0 sm:$0xff]  ;;  %v919_v53 = vmov 683565275   ;;  %vm560_vm11 = vcmask 261120  }
   0x4   :  { %v920_v57 = vmov 2475754826   ;;  %v921_v59 = vmov 2131351028   ;;  %v922_v61 = vmov 2102212464  }
   0x5   :  { %v923_v63 = vmov 920167782   ;;  %s929_s11 = smov [#allocation2]  }
   0x6   :  { %61 = vperm.xlu1 %863, %v971_v3   ;;  %33 = vperm.xlu0 %862, %v971_v3   ;;  %s749_s12 = sshll.u32 %s929_s11, 4  ;;  %s750_s12 = int_to_ptr.vmem [resolvable:$true] %s749_s12 }
   0x7   :  { %s891_s13 = scalar_lea.vmem %s750_s12, 128  ;;  %p896_p1 = scmp.lt.s32.totalorder %s750_s12, %s750_s12 }
   0x8   :  { %p892_p0 = scmp.ne.s32.totalorder %s750_s12, %s891_s13  ;;  %p897_p2 = scmp.lt.s32.totalorder %s891_s13, %s891_s13 }
   0xa   :  { %864 = vset.pattern.permute.xlu1 %v916_v2  ;;  %38 = vperm.xlu0 %862, %v978_v4   ;;  %p898_p3 = por %p897_p2, %p896_p1 }
   0xb   :  { %43 = vperm.xlu1 %864, %v983_v5  }
   0xc   :  { %p899_p4 = pnand %p898_p3, %p892_p0 }
   0xe   :  { %865 = vset.pattern.permute.xlu0 %v917_v6 }
   0xf   :  { %866 = vset.pattern.permute.xlu1 %v917_v6  ;;  %77 = vperm.xlu0 %865, %v963_v0  }
  0x10   :  { %81 = vperm.xlu1 %866, %v971_v3  }
  0x13   :  { %868 = vset.pattern.permute.xlu0 %v915_v1 }
  0x14   :  { %867 = vset.pattern.permute.xlu1 %v915_v1  ;;  %69 = vperm.xlu0 %868, %v983_v5  }
  0x15   :  { %65 = vperm.xlu1 %867, %v978_v4  }
  0x18   :  { %870 = vset.pattern.permute.xlu0 %v918_v7 }
  0x19   :  { %869 = vset.pattern.permute.xlu1 %v917_v6  ;;  %517 = vperm.xlu0 %870, %v963_v0  }
  0x1a   :  { %85 = vperm.xlu1 %869, %v978_v4  }
  0x1d   :  { %529 = vperm.xlu0 %870, %v983_v5  }
  0x1e   :  { %89 = vperm.xlu1 %869, %v983_v5  }
  0x22   :  { %871 = vset.pattern.permute.xlu1 %v918_v7 }
  0x23   :  { %521 = vperm.xlu1 %871, %v971_v3  }
  0x27   :  { %525 = vperm.xlu1 %871, %v978_v4  }
  0x81   :  { %v58_v8 = vpop.permute.xlu1 %57  ;;  %v29_v9 = vpop.permute.xlu0 %28 }
  0x82   :  { %v52_v13 = vmul.f32 %v757_v12, %v29_v9 }
  0x84   :  { %v1001_v17 = vadd.f32 %v58_v8, %v52_v13 }
  0x85   :  { %v62_v10 = vpop.permute.xlu1 %61  ;;  %v34_v11 = vpop.permute.xlu0 %33 }
  0x86   :  { %v53_v15 = vmul.f32 %v757_v12, %v34_v11  ;;  %v924_v11 = vmov 1326507024  }
  0x88   :  { %v1003_v19 = vadd.f32 %v62_v10, %v53_v15 }
  0x89   :  { %v39_v14 = vpop.permute.xlu0 %38 }
  0x8a   :  { %v44_v16 = vpop.permute.xlu1 %43  ;;  %v54_v33 = vmul.f32 %v757_v12, %v39_v14 }
  0x8b   :  { %v55_v42 = vmul.f32 %v757_v12, %v44_v16 }
  0x8e   :  { %v78_v18 = vpop.permute.xlu0 %77 }
  0x8f   :  { %v1006_v20 = vmul.f32 %v78_v18, %v1001_v17  ;;  %v82_v21 = vpop.permute.xlu1 %81 }
  0x90   :  { %v1009_v22 = vmul.f32 %v82_v21, %v1003_v19 }
  0x91   :  { %v96_v23 = vand.u32 2147483647, %v1006_v20  ;;  %v99_v24 = vand.u32 2139095040, %v1006_v20 }
  0x92   :  { %v200_v25 = vand.u32 2147483647, %v1009_v22  ;;  %v203_v26 = vand.u32 2139095040, %v1009_v22 }
  0x93   :  { %v100_v27 = vshrl.u32 %v99_v24, 23  ;;  %v103_v28 = vand.u32 8388607, %v96_v23  ;;  %v70_v40 = vpop.permute.xlu0 %69 }
  0x94   :  { %v204_v29 = vshrl.u32 %v203_v26, 23  ;;  %v207_v30 = vand.u32 8388607, %v200_v25  ;;  %v66_v31 = vpop.permute.xlu1 %65  ;;  %v1030_v51 = vadd.f32 %v70_v40, %v55_v42 }
  0x95   :  { %v758_v32 = vadd.s32 4294967169, %v100_v27  ;;  %v104_v36 = vor.u32 8388608, %v103_v28  ;;  %v1019_v39 = vadd.f32 %v66_v31, %v54_v33 }
  0x96   :  { %v762_v34 = vadd.s32 4294967169, %v204_v29  ;;  %v208_v37 = vor.u32 8388608, %v207_v30 }
  0x97   :  { %v106_v35 = vadd.s32 1, %v758_v32  ;;  %v1024_v48 = vshll.u32 %v104_v36, 8 }
  0x98   :  { %v210_v38 = vadd.s32 1, %v762_v34  ;;  %v1028_v50 = vshll.u32 %v208_v37, 8 }
  0x99   :  { %vm107_vm0 = vcmp.gt.s32.totalorder %v106_v35, 0  ;;  %v86_v41 = vpop.permute.xlu1 %85 }
  0x9a   :  { %v108_v43 = vsel %vm107_vm0, %v106_v35, 0  ;;  %vm211_vm1 = vcmp.gt.s32.totalorder %v210_v38, 0  ;;  %v1022_v44 = vmul.f32 %v86_v41, %v1019_v39 }
  0x9b   :  { %v109_v45 = vshrl.u32 %v108_v43, 5  ;;  %v110_v46 = vand.u32 31, %v108_v43  ;;  %v212_v47 = vsel %vm211_vm1, %v210_v38, 0 }
  0x9c   :  { %v1026_v49 = vshrl.u32 %v212_v47, 5  ;;  %v214_v55 = vand.u32 31, %v212_v47  ;;  %v304_v56 = vand.u32 2147483647, %v1022_v44 }
  0x9d   :  { %v111_v52 = vsub.s32 32, %v110_v46  ;;  %v113_v54 = vshll.u32 %v919_v53, %v110_v46  ;;  %v116_v58 = vshll.u32 %v920_v57, %v110_v46  ;;  %v119_v60 = vshll.u32 %v921_v59, %v110_v46 }
  0x9e   :  { %v122_v62 = vshll.u32 %v922_v61, %v110_v46  ;;  %v125_v1 = vshll.u32 %v923_v63, %v110_v46  ;;  %vm128_vm2 = vcmp.lt.s32.totalorder %v109_v45, 1  ;;  %vm129_vm3 = vcmp.lt.s32.totalorder %v109_v45, 2 }
  0x9f   :  { %v114_v6 = vshrl.u32 %v920_v57, %v111_v52  ;;  %v117_v7 = vshrl.u32 %v921_v59, %v111_v52  ;;  %v120_v8 = vshrl.u32 %v922_v61, %v111_v52  ;;  %v112_v9 = vshrl.u32 %v919_v53, %v111_v52 }
  0xa0   :  { %v123_v10 = vshrl.u32 %v923_v63, %v111_v52  ;;  %v126_v12 = vshrl.u32 %v924_v11, %v111_v52  ;;  %v215_v16 = vsub.s32 32, %v214_v55  ;;  %vm130_vm4 = vcmp.lt.s32.totalorder %v109_v45, 3 }
  0xa1   :  { %v115_v13 = vor.u32 %v114_v6, %v113_v54  ;;  %v118_v14 = vor.u32 %v117_v7, %v116_v58  ;;  %v121_v15 = vor.u32 %v120_v8, %v119_v60  ;;  %vm131_vm5 = vcmp.lt.s32.totalorder %v109_v45, 4 }
  0xa2   :  { %v124_v18 = vor.u32 %v123_v10, %v122_v62  ;;  %v127_v21 = vor.u32 %v126_v12, %v125_v1  ;;  %v217_v32 = vshll.u32 %v919_v53, %v214_v55  ;;  %v218_v35 = vshrl.u32 %v920_v57, %v215_v16 }
  0xa3   :  { %v132_v24 = vsel %vm128_vm2, %v112_v9, %v115_v13  ;;  %v133_v26 = vsel %vm131_vm5, %v121_v15, 2102212464  ;;  %v136_v27 = vsel %vm128_vm2, %v115_v13, %v118_v14  ;;  %v140_v28 = vsel %vm128_vm2, %v118_v14, %v121_v15 }
  0xa4   :  { %v134_v29 = vsel %vm130_vm4, %v118_v14, %v133_v26  ;;  %v137_v30 = vsel %vm131_vm5, %v124_v18, 920167782  ;;  %v141_v31 = vsel %vm131_vm5, %v127_v21, 1326507024  ;;  %v220_v36 = vshll.u32 %v920_v57, %v214_v55 }
  0xa5   :  { %v138_v33 = vsel %vm130_vm4, %v121_v15, %v137_v30  ;;  %v142_v34 = vsel %vm130_vm4, %v124_v18, %v141_v31  ;;  %v135_v37 = vsel %vm129_vm3, %v132_v24, %v134_v29  ;;  %v221_v41 = vshrl.u32 %v921_v59, %v215_v16  ;;  %v90_v31 = vpop.permute.xlu1 %89 }
  0xa6   :  { %v139_v38 = vsel %vm129_vm3, %v136_v27, %v138_v33  ;;  %v143_v40 = vsel %vm129_vm3, %v140_v28, %v142_v34  ;;  %v219_v52 = vor.u32 %v218_v35, %v217_v32  ;;  %v223_v58 = vshll.u32 %v921_v59, %v214_v55 }
  0xa7   :  { %v1055_v42 = vmul.u32.u64.low %v1024_v48, %v143_v40  ;;  %v1056_v43 = vmul.u32.u64.high %v1024_v48, %v143_v40, %v1055_v42  ;;  %v1059_v46 = vmul.u32.u64.low %v1024_v48, %v139_v38  ;;  %v1060_v47 = vmul.u32.u64.high %v1024_v48, %v139_v38, %v1059_v46  ;;  %v540_v40 = vld [vmem:[%s1330_s2] sm:$0xff] }
  0xa8   :  { %v222_v54 = vor.u32 %v221_v41, %v220_v36  ;;  %v224_v60 = vshrl.u32 %v922_v61, %v215_v16  ;;  %v216_v45 = vshrl.u32 %v919_v53, %v215_v16  ;;  %v226_v62 = vshll.u32 %v922_v61, %v214_v55  ;;  %800 = vmatprep.mubr.msk.f32.mxu0 %vm560_vm11, %v540_v40 }
  0xa9   :  { %v227_v1 = vshrl.u32 %v923_v63, %v215_v16  ;;  %v230_v6 = vshrl.u32 %v924_v11, %v215_v16  ;;  %v151_v7 = vmul.u32 %v1024_v48, %v135_v37  ;;  %v229_v9 = vshll.u32 %v923_v63, %v214_v55 }
  0xaa   :  { %v225_v8 = vor.u32 %v224_v60, %v223_v58  ;;  %vm232_vm6 = vcmp.lt.s32.totalorder %v1026_v49, 1  ;;  %vm153_vm7 = vc.u32 %v1056_v43, %v1059_v46  ;;  %v154_v10 = vadd.s32 1, %v1060_v47 }
  0xab   :  { %v228_v12 = vor.u32 %v227_v1, %v226_v62  ;;  %vm233_vm8 = vcmp.lt.s32.totalorder %v1026_v49, 2  ;;  %v231_v13 = vor.u32 %v230_v6, %v229_v9  ;;  %vm234_vm9 = vcmp.lt.s32.totalorder %v1026_v49, 3 }
  0xac   :  { %vm235_vm10 = vcmp.lt.s32.totalorder %v1026_v49, 4  ;;  %v240_v14 = vsel %vm232_vm6, %v219_v52, %v222_v54  ;;  %v155_v48 = vsel %vm153_vm7, %v154_v10, %v1060_v47  ;;  %v244_v16 = vsel %vm232_vm6, %v222_v54, %v225_v8 }
  0xad   :  { %v237_v15 = vsel %vm235_vm10, %v225_v8, 2102212464  ;;  %v241_v55 = vsel %vm235_vm10, %v228_v12, 920167782  ;;  %v156_v18 = vadd.s32 %v155_v48, %v151_v7  ;;  %v236_v21 = vsel %vm232_vm6, %v216_v45, %v219_v52 }
  0xae   :  { %v242_v24 = vsel %vm234_vm9, %v225_v8, %v241_v55  ;;  %v245_v26 = vsel %vm235_vm10, %v231_v13, 1326507024  ;;  %v238_v27 = vsel %vm234_vm9, %v222_v54, %v237_v15  ;;  %v307_v30 = vand.u32 2139095040, %v1022_v44 }
  0xaf   :  { %v243_v28 = vsel %vm233_vm8, %v240_v14, %v242_v24  ;;  %v246_v29 = vsel %vm234_vm9, %v228_v12, %v245_v26  ;;  %v157_v32 = vadd.s32 536870912, %v156_v18  ;;  %v239_v42 = vsel %vm233_vm8, %v236_v21, %v238_v27 }
  0xb0   :  { %v247_v33 = vsel %vm233_vm8, %v244_v16, %v246_v29  ;;  %v1085_v34 = vmul.u32.u64.low %v1028_v50, %v243_v28  ;;  %v1086_v35 = vmul.u32.u64.high %v1028_v50, %v243_v28, %v1085_v34  ;;  %v308_v38 = vshrl.u32 %v307_v30, 23 }
  0xb1   :  { %v1090_v36 = vmul.u32.u64.low %v1028_v50, %v247_v33  ;;  %v1091_v37 = vmul.u32.u64.high %v1028_v50, %v247_v33, %v1090_v36  ;;  %v1096_v41 = vshrl.u32 %v157_v32, 30  ;;  %v311_v47 = vand.u32 8388607, %v304_v56 }
  0xb2   :  { %v1103_v52 = vmul.f32 %v90_v31, %v1030_v51  ;;  %v766_v54 = vadd.s32 4294967169, %v308_v38  ;;  %v258_v60 = vadd.s32 1, %v1086_v35  ;;  %v925_v45 = vmov 4  }
  0xb3   :  { %v159_v58 = vshll.u32 %v1096_v41, 30  ;;  %872 = vset.pattern.permute.xlu1 %v925_v45  ;;  %v255_v62 = vmul.u32 %v1028_v50, %v239_v42  ;;  %vm257_vm12 = vc.u32 %v1091_v37, %v1085_v34  ;;  %v312_v49 = vor.u32 8388608, %v311_v47  ;;  %873 = vset.pattern.permute.xlu0 %v925_v45 }
  0xb4   :  { %v314_v1 = vadd.s32 1, %v766_v54  ;;  %545 = vperm.xlu1 %872, %v963_v0   ;;  %v259_v7 = vsel %vm257_vm12, %v258_v60, %v1086_v35  ;;  %v408_v8 = vand.u32 2147483647, %v1103_v52  ;;  %v411_v9 = vand.u32 2139095040, %v1103_v52  ;;  %549 = vperm.xlu0 %873, %v971_v3  }
  0xb5   :  { %v1112_v6 = vsub.s32 %v156_v18, %v159_v58  ;;  %v260_v10 = vadd.s32 %v259_v7, %v255_v62  ;;  %v152_v0 = vadd.s32 %v1059_v46, %v1056_v43  ;;  %v1123_v16 = vshll.u32 %v312_v49, 8 }
  0xb6   :  { %vm315_vm13 = vcmp.gt.s32.totalorder %v314_v1, 0  ;;  %v412_v13 = vshrl.u32 %v411_v9, 23  ;;  %v1127_v3 = vand.u32 8388607, %v408_v8  ;;  %vm98_vm3 = vcmp.lt.s32.totalorder %v1006_v20, 0 }
  0xb7   :  { %v162_v50 = vsub.s32 0, %v1112_v6  ;;  %v316_v12 = vsel %vm315_vm13, %v314_v1, 0  ;;  %v261_v14 = vadd.s32 536870912, %v260_v10  ;;  %vm1189_vm7 = vcmp.le.f32.partialorder %v96_v23, 0.7853982 }
  0xb8   :  { %v318_v48 = vand.u32 31, %v316_v12  ;;  %553 = vperm.xlu1 %872, %v978_v4   ;;  %v317_v55 = vshrl.u32 %v316_v12, 5  ;;  %874 = vset.pattern.permute.xlu0 %v916_v2  ;;  %v770_v46 = vadd.s32 4294967169, %v412_v13  ;;  %vm202_vm8 = vcmp.lt.s32.totalorder %v1009_v22, 0 }
  0xb9   :  { %v759_v15 = vmin.u32 %v162_v50, %v1112_v6  ;;  %v1130_v18 = vshrl.u32 %v261_v14, 30  ;;  %vm1217_vm10 = vcmp.le.f32.partialorder %v200_v25, 0.7853982 }
  0xba   :  { %v319_v21 = vsub.s32 32, %v318_v48  ;;  %v321_v43 = vshll.u32 %v919_v53, %v318_v48  ;;  %v324_v4 = vshll.u32 %v920_v57, %v318_v48  ;;  %v327_v26 = vshll.u32 %v921_v59, %v318_v48 }
  0xbb   :  { %v164_v24 = vclz %v759_v15  ;;  %v330_v27 = vshll.u32 %v922_v61, %v318_v48  ;;  %v263_v28 = vshll.u32 %v1130_v18, 30  ;;  %v333_v2 = vshll.u32 %v923_v63, %v318_v48 }
  0xbc   :  { %v322_v29 = vshrl.u32 %v920_v57, %v319_v21  ;;  %v325_v30 = vshrl.u32 %v921_v59, %v319_v21  ;;  %557 = vperm.xlu1 %872, %v983_v5   ;;  %v328_v32 = vshrl.u32 %v922_v61, %v319_v21  ;;  %v331_v33 = vshrl.u32 %v923_v63, %v319_v21 }
  0xbd   :  { %v760_v31 = vadd.s32 4294967294, %v164_v24  ;;  %v334_v35 = vshrl.u32 %v924_v11, %v319_v21  ;;  %v1144_v36 = vsub.s32 %v260_v10, %v263_v28  ;;  %v320_v38 = vshrl.u32 %v919_v53, %v319_v21 }
  0xbe   :  { %v323_v40 = vor.u32 %v322_v29, %v321_v43  ;;  %v326_v42 = vor.u32 %v325_v30, %v324_v4  ;;  %v329_v47 = vor.u32 %v328_v32, %v327_v26  ;;  %v332_v54 = vor.u32 %v331_v33, %v330_v27 }
  0xbf   :  { %vm761_vm14 = vcmp.lt.s32.totalorder %v760_v31, 0  ;;  %vm336_vm15 = vcmp.lt.s32.totalorder %v317_v55, 1  ;;  %v266_v5 = vsub.s32 0, %v1144_v36  ;;  %v335_v60 = vor.u32 %v334_v35, %v333_v2 }
  0xc0   :  { %v167_v58 = vsel %vm761_vm14, 0, %v760_v31  ;;  %vm337_vm0 = vcmp.lt.s32.totalorder %v317_v55, 2  ;;  %vm338_vm1 = vcmp.lt.s32.totalorder %v317_v55, 3  ;;  %vm339_vm2 = vcmp.lt.s32.totalorder %v317_v55, 4 }
  0xc1   :  { %v168_v45 = vsub.s32 32, %v167_v58  ;;  %v172_v62 = vsub.s32 4294967266, %v167_v58  ;;  %v169_v49 = vshll.u32 %v1112_v6, %v167_v58  ;;  %v763_v1 = vmin.u32 %v266_v5, %v1144_v36 }
  0xc2   :  { %v341_v7 = vsel %vm339_vm2, %v329_v47, 2102212464  ;;  %v344_v9 = vsel %vm336_vm15, %v323_v40, %v326_v42  ;;  %v340_v12 = vsel %vm336_vm15, %v320_v38, %v323_v40  ;;  %v345_v13 = vsel %vm339_vm2, %v332_v54, 920167782 }
  0xc3   :  { %v170_v10 = vshrl.u32 %v152_v0, %v168_v45  ;;  %v173_v50 = vadd.s32 127, %v172_v62  ;;  %v268_v14 = vclz %v763_v1  ;;  %v342_v48 = vsel %vm338_vm1, %v326_v42, %v341_v7 }
  0xc4   :  { %v346_v15 = vsel %vm338_vm1, %v329_v47, %v345_v13  ;;  %v348_v21 = vsel %vm336_vm15, %v326_v42, %v329_v47  ;;  %v349_v4 = vsel %vm339_vm2, %v335_v60, 1326507024  ;;  %v343_v30 = vsel %vm337_vm0, %v340_v12, %v342_v48 }
  0xc5   :  { %v171_v6 = vor.u32 %v170_v10, %v169_v49  ;;  %v174_v43 = vshll.u32 %v173_v50, 23  ;;  %v347_v24 = vsel %vm337_vm0, %v344_v9, %v346_v15  ;;  %v764_v26 = vadd.s32 4294967294, %v268_v14 }
  0xc6   :  { %v350_v0 = vsel %vm338_vm1, %v332_v54, %v349_v4  ;;  %v1162_v27 = vmul.u32.u64.low %v1123_v16, %v347_v24  ;;  %v1163_v28 = vmul.u32.u64.high %v1123_v16, %v347_v24, %v1162_v27  ;;  %v182_v31 = vsub.s32 4, %v1096_v41 }
  0xc7   :  { %v175_v29 = vor.u32 4788187, %v174_v43  ;;  %v351_v2 = vsel %vm337_vm0, %v348_v21, %v350_v0  ;;  %vm765_vm4 = vcmp.lt.s32.totalorder %v764_v26, 0  ;;  %v418_v35 = vadd.s32 1, %v770_v46 }
  0xc8   :  { %v1170_v32 = vmul.u32.u64.low %v1123_v16, %v351_v2  ;;  %v1171_v33 = vmul.u32.u64.high %v1123_v16, %v351_v2, %v1170_v32  ;;  %v178_v40 = vcvt.s32.f32 %v171_v6  ;;  %v256_v42 = vadd.s32 %v1085_v34, %v1091_v37 }
  0xc9   :  { %v176_v38 = vand.u32 2147483647, %v175_v29  ;;  %v271_v47 = vsel %vm765_vm4, 0, %v764_v26  ;;  %v362_v5 = vadd.s32 1, %v1163_v28  ;;  %v416_v55 = vor.u32 8388608, %v1127_v3 }
  0xca   :  { %v272_v54 = vsub.s32 32, %v271_v47  ;;  %v276_v58 = vsub.s32 4294967266, %v271_v47  ;;  %v359_v45 = vmul.u32 %v1123_v16, %v343_v30  ;;  %vm419_vm5 = vcmp.gt.s32.totalorder %v418_v35, 0 }
  0xcb   :  { %v179_v60 = vmul.f32 %v178_v40, %v176_v38  ;;  %v1181_v46 = vsel %vm98_vm3, %v182_v31, %v1096_v41  ;;  %v273_v62 = vshll.u32 %v1144_v36, %v271_v47  ;;  %vm361_vm6 = vc.u32 %v1171_v33, %v1162_v27 }
  0xcc   :  { %v274_v49 = vshrl.u32 %v256_v42, %v272_v54  ;;  %v277_v34 = vadd.s32 127, %v276_v58  ;;  %v363_v1 = vsel %vm361_vm6, %v362_v5, %v1163_v28  ;;  %v420_v3 = vsel %vm419_vm5, %v418_v35, 0 }
  0xcd   :  { %v180_v37 = vxor.u32 2147483648, %v179_v60  ;;  %v364_v9 = vadd.s32 %v363_v1, %v359_v45  ;;  %v421_v10 = vshrl.u32 %v420_v3, 5  ;;  %v422_v36 = vand.u32 31, %v420_v3 }
  0xce   :  { %v275_v7 = vor.u32 %v274_v49, %v273_v62  ;;  %v278_v41 = vshll.u32 %v277_v34, 23  ;;  %v1193_v50 = vshll.u32 %v416_v55, 8  ;;  %v185_v12 = vsel %vm1189_vm7, 0, %v1181_v46 }
  0xcf   :  { %v286_v13 = vsub.s32 4, %v1130_v18  ;;  %v181_v14 = vsel %vm98_vm3, %v180_v37, %v179_v60  ;;  %v365_v15 = vadd.s32 536870912, %v364_v9  ;;  %v423_v21 = vsub.s32 32, %v422_v36 }
  0xd0   :  { %v279_v23 = vor.u32 4788187, %v278_v41  ;;  %v282_v48 = vcvt.s32.f32 %v275_v7  ;;  %v425_v6 = vshll.u32 %v919_v53, %v422_v36  ;;  %v428_v43 = vshll.u32 %v920_v57, %v422_v36 }
  0xd1   :  { %vm440_vm9 = vcmp.lt.s32.totalorder %v421_v10, 1  ;;  %v1204_v4 = vshrl.u32 %v365_v15, 30  ;;  %v431_v26 = vshll.u32 %v921_v59, %v422_v36  ;;  %v434_v0 = vshll.u32 %v922_v61, %v422_v36 }
  0xd2   :  { %v280_v24 = vand.u32 2147483647, %v279_v23  ;;  %v426_v28 = vshrl.u32 %v920_v57, %v423_v21  ;;  %v429_v29 = vshrl.u32 %v921_v59, %v423_v21  ;;  %v432_v30 = vshrl.u32 %v922_v61, %v423_v21 }
  0xd3   :  { %v437_v2 = vshll.u32 %v923_v63, %v422_v36  ;;  %v367_v32 = vshll.u32 %v1204_v4, 30  ;;  %v435_v35 = vshrl.u32 %v923_v63, %v423_v21  ;;  %v438_v38 = vshrl.u32 %v924_v11, %v423_v21 }
  0xd4   :  { %v283_v31 = vmul.f32 %v282_v48, %v280_v24  ;;  %v424_v57 = vshrl.u32 %v919_v53, %v423_v21  ;;  %v427_v59 = vor.u32 %v426_v28, %v425_v6  ;;  %v430_v42 = vor.u32 %v429_v29, %v428_v43 }
  0xd5   :  { %v433_v61 = vor.u32 %v432_v30, %v431_v26  ;;  %v368_v54 = vsub.s32 %v364_v9, %v367_v32  ;;  %v436_v58 = vor.u32 %v435_v35, %v434_v0  ;;  %v439_v5 = vor.u32 %v438_v38, %v437_v2 }
  0xd6   :  { %v284_v47 = vxor.u32 2147483648, %v283_v31  ;;  %vm441_vm12 = vcmp.lt.s32.totalorder %v421_v10, 2  ;;  %vm442_vm13 = vcmp.lt.s32.totalorder %v421_v10, 3  ;;  %vm443_vm14 = vcmp.lt.s32.totalorder %v421_v10, 4 }
  0xd7   :  { %v448_v63 = vsel %vm440_vm9, %v427_v59, %v430_v42  ;;  %v370_v11 = vsub.s32 0, %v368_v54  ;;  %v444_v25 = vsel %vm440_vm9, %v424_v57, %v427_v59  ;;  %v445_v55 = vsel %vm443_vm14, %v433_v61, 2102212464 }
  0xd8   :  { %v449_v60 = vsel %vm443_vm14, %v436_v58, 920167782  ;;  %v446_v45 = vsel %vm442_vm13, %v430_v42, %v445_v55  ;;  %v452_v53 = vsel %vm440_vm9, %v430_v42, %v433_v61  ;;  %v453_v62 = vsel %vm443_vm14, %v439_v5, 1326507024 }
  0xd9   :  { %v450_v46 = vsel %vm442_vm13, %v433_v61, %v449_v60  ;;  %v285_v49 = vsel %vm202_vm8, %v284_v47, %v283_v31  ;;  %v767_v34 = vmin.u32 %v370_v11, %v368_v54  ;;  %v454_v1 = vsel %vm442_vm13, %v436_v58, %v453_v62 }
  0xda   :  { %v451_v37 = vsel %vm441_vm12, %v448_v63, %v450_v46  ;;  %v447_v3 = vsel %vm441_vm12, %v444_v25, %v446_v45  ;;  %v455_v7 = vsel %vm441_vm12, %v452_v53, %v454_v1  ;;  %v184_v15 = vsel %vm1189_vm7, %v1006_v20, %v181_v14 }
  0xdb   :  { %v1231_v41 = vmul.u32.u64.low %v1193_v50, %v451_v37  ;;  %v1232_v9 = vmul.u32.u64.high %v1193_v50, %v451_v37, %v1231_v41  ;;  %v372_v36 = vclz %v767_v34  ;;  %875 = vcosq.f32 %v184_v15  ;;  %v518_v34 = vpop.permute.xlu0 %517 }
  0xdc   :  { %v1236_v23 = vmul.u32.u64.low %v1193_v50, %v455_v7  ;;  %v1237_v48 = vmul.u32.u64.high %v1193_v50, %v455_v7, %v1236_v23  ;;  %v287_v10 = vsel %vm202_vm8, %v286_v13, %v1130_v18  ;;  %v288_v21 = vsel %vm1217_vm10, %v1009_v22, %v285_v49 }
  0xdd   :  { %v768_v6 = vadd.s32 4294967294, %v372_v36  ;;  %877 = vsinq.f32 %v184_v15  ;;  %v463_v43 = vmul.u32 %v1193_v50, %v447_v3  ;;  %v466_v24 = vadd.s32 1, %v1232_v9  ;;  %v522_v23 = vpop.permute.xlu1 %521 }
  0xde   :  { %v189_v26 = vadd.s32 3, %v185_v12  ;;  %879 = vcosq.f32 %v288_v21  ;;  %vm465_vm0 = vc.u32 %v1237_v48, %v1231_v41  ;;  %v289_v16 = vsel %vm1217_vm10, 0, %v287_v10 }
  0xdf   :  { %vm769_vm15 = vcmp.lt.s32.totalorder %v768_v6, 0  ;;  %881 = vsinq.f32 %v288_v21  ;;  %v467_v13 = vsel %vm465_vm0, %v466_v24, %v1232_v9  ;;  %v360_v14 = vadd.s32 %v1162_v27, %v1171_v33 }
  0xe0   :  { %v375_v18 = vsel %vm769_vm15, 0, %v768_v6  ;;  %v468_v28 = vadd.s32 %v467_v13, %v463_v43  ;;  %v190_v29 = vand.u32 3, %v189_v26  ;;  %v293_v12 = vadd.s32 3, %v289_v16 }
  0xe1   :  { %v376_v0 = vsub.s32 32, %v375_v18  ;;  %v380_v50 = vsub.s32 4294967266, %v375_v18  ;;  %v377_v30 = vshll.u32 %v368_v54, %v375_v18  ;;  %vm188_vm1 = vweird.f32 %v1006_v20 }
  0xe2   :  { %v469_v32 = vadd.s32 536870912, %v468_v28  ;;  %v294_v59 = vand.u32 3, %v293_v12  ;;  %vm191_vm2 = vcmp.lt.s32.totalorder %v190_v29, 2  ;;  %vm192_vm3 = vcmp.eq.s32.totalorder %v190_v29, 0 }
  0xe3   :  { %v378_v2 = vshrl.u32 %v360_v14, %v376_v0  ;;  %v381_v31 = vadd.s32 127, %v380_v50  ;;  %vm195_vm4 = vcmp.eq.s32.totalorder %v190_v29, 2  ;;  %vm292_vm7 = vweird.f32 %v1009_v22 }
  0xe4   :  { %v1257_v40 = vshrl.u32 %v469_v32, 30  ;;  %vm296_vm5 = vcmp.eq.s32.totalorder %v294_v59, 0  ;;  %vm299_vm6 = vcmp.eq.s32.totalorder %v294_v59, 2  ;;  %vm295_vm8 = vcmp.lt.s32.totalorder %v294_v59, 2 }
  0xe5   :  { %v379_v35 = vor.u32 %v378_v2, %v377_v30  ;;  %v382_v38 = vshll.u32 %v381_v31, 23  ;;  %v876_v57 = vpop.eup %875  ;;  %vm306_vm9 = vcmp.lt.s32.totalorder %v1022_v44, 0  ;;  %vm1272_vm12 = vcmp.le.f32.partialorder %v304_v56, 0.7853982 }
  0xe6   :  { %v471_v27 = vshll.u32 %v1257_v40, 30  ;;  %v196_v33 = vxor.u32 2147483648, %v876_v57  ;;  %v464_v14 = vadd.s32 %v1231_v41, %v1237_v48  ;;  %vm410_vm13 = vcmp.lt.s32.totalorder %v1103_v52, 0 }
  0xe7   :  { %v878_v42 = vpop.eup %877  ;;  %v383_v61 = vor.u32 4788187, %v382_v38  ;;  %v386_v58 = vcvt.s32.f32 %v379_v35  ;;  %v494_v38 = vsub.s32 4, %v1257_v40  ;;  %vm409_vm14 = vcmp.le.f32.partialorder %v408_v8, 0.7853982 }
  0xe8   :  { %v880_v47 = vpop.eup %879  ;;  %v193_v54 = vxor.u32 2147483648, %v878_v42  ;;  %v472_v11 = vsub.s32 %v468_v28, %v471_v27  ;;  %v197_v25 = vsel %vm195_vm4, %v196_v33, %v878_v42  ;;  %v390_v28 = vsub.s32 4, %v1204_v4 }
  0xe9   :  { %v882_v5 = vpop.eup %881  ;;  %v384_v63 = vand.u32 2147483647, %v383_v61  ;;  %v300_v55 = vxor.u32 2147483648, %v880_v47 }
  0xea   :  { %v194_v60 = vsel %vm192_vm3, %v876_v57, %v193_v54  ;;  %v297_v45 = vxor.u32 2147483648, %v882_v5  ;;  %v474_v53 = vsub.s32 0, %v472_v11  ;;  %v391_v2 = vsel %vm306_vm9, %v390_v28, %v1204_v4 }
  0xeb   :  { %v387_v46 = vmul.f32 %v386_v58, %v384_v63  ;;  %v198_v62 = vsel %vm191_vm2, %v194_v60, %v197_v25  ;;  %v301_v49 = vsel %vm299_vm6, %v300_v55, %v882_v5  ;;  %v393_v32 = vsel %vm1272_vm12, 0, %v391_v2 }
  0xec   :  { %v199_v37 = vsel %vm188_vm1, nan, %v198_v62  ;;  %v298_v1 = vsel %vm296_vm5, %v880_v47, %v297_v45  ;;  %v771_v7 = vmin.u32 %v474_v53, %v472_v11  ;;  %v397_v57 = vadd.s32 3, %v393_v32 }
  0xed   :  { %v388_v3 = vxor.u32 2147483648, %v387_v46  ;;  %v512_v9 = vmul.f32 %v199_v37, %v199_v37  ;;  %v302_v36 = vsel %vm295_vm8, %v298_v1, %v301_v49  ;;  %v495_v4 = vsel %vm410_vm13, %v494_v38, %v1257_v40 }
  0xee   :  { %v303_v15 = vsel %vm292_vm7, nan, %v302_v36  ;;  %v476_v10 = vclz %v771_v7  ;;  %v398_v33 = vand.u32 3, %v397_v57  ;;  %v497_v5 = vsel %vm409_vm14, 0, %v495_v4  ;;  %v530_v36 = vpop.permute.xlu0 %529 }
  0xef   :  { %v532_v21 = vmul.f32 %v518_v34, %v512_v9  ;;  %v513_v6 = vmul.f32 %v303_v15, %v303_v15  ;;  %v389_v43 = vsel %vm306_vm9, %v388_v3, %v387_v46  ;;  %v501_v25 = vadd.s32 3, %v497_v5  ;;  %v526_v34 = vpop.permute.xlu1 %525 }
  0xf0   :  { %v772_v20 = vadd.s32 4294967294, %v476_v10  ;;  %v392_v13 = vsel %vm1272_vm12, %v1022_v44, %v389_v43  ;;  %vm400_vm15 = vcmp.eq.s32.totalorder %v398_v33, 0  ;;  %vm403_vm0 = vcmp.eq.s32.totalorder %v398_v33, 2  ;;  %v663_v43 = vld [vmem:[%s1332_s4] sm:$0xff] }
  0xf1   :  { %v536_v24 = vadd.f32 %v532_v21, %v1001_v17  ;;  %v533_v22 = vmul.f32 %v522_v23, %v513_v6  ;;  %883 = vcosq.f32 %v392_v13  ;;  %vm399_vm1 = vcmp.lt.s32.totalorder %v398_v33, 2  ;;  %v541_v21 = vld [vmem:[%s1330_s2 + $0x8] sm:$0xff]  ;;  %666 = vperm.xlu0 %874, %v663_v43  }
  0xf2   :  { %vm773_vm10 = vcmp.lt.s32.totalorder %v772_v20, 0  ;;  %885 = vsinq.f32 %v392_v13  ;;  %v502_v60 = vand.u32 3, %v501_v25  ;;  %vm396_vm2 = vweird.f32 %v1022_v44 }
  0xf3   :  { %v537_v26 = vadd.f32 %v533_v22, %v1003_v19  ;;  %v479_v18 = vsel %vm773_vm10, 0, %v772_v20  ;;  %vm500_vm6 = vweird.f32 %v1103_v52  ;;  %vm927_vm7 = vmmov 0  }
  0xf4   :  { %v480_v0 = vsub.s32 32, %v479_v18  ;;  %v484_v17 = vsub.s32 4294967266, %v479_v18  ;;  %v481_v19 = vshll.u32 %v472_v11, %v479_v18  ;;  %vm507_vm3 = vcmp.eq.s32.totalorder %v502_v60, 2 }
  0xf5   :  { %v817_v50 = vpack.c.bf16 %v537_v26, %v536_v24  ;;  %vm504_vm4 = vcmp.eq.s32.totalorder %v502_v60, 0  ;;  %vm503_vm5 = vcmp.lt.s32.totalorder %v502_v60, 2  ;;  %v928_v6 = vmov 0.0  }
  0xf6   :  { %v482_v29 = vshrl.u32 %v464_v14, %v480_v0  ;;  %v485_v12 = vadd.s32 127, %v484_v17  ;;  %814 = vmatprep.mubr.msk.f32.mxu1 %vm927_vm7, %v928_v6 }
  0xf7   :  { %818 = vmatprep.subr.bf16.mxu0 %v817_v50 }
  0xf8   :  { %820 = vmatpush3.bf16.msra.mxu0 %v817_v50  ;;  %v483_v56 = vor.u32 %v482_v29, %v481_v19  ;;  %v486_v30 = vshll.u32 %v485_v12, 23 }
  0xfa   :  { %v487_v31 = vor.u32 4788187, %v486_v30  ;;  %v490_v48 = vcvt.s32.f32 %v483_v56 }
  0xfb   :  { %v884_v59 = vpop.eup %883 }
  0xfc   :  { %v488_v41 = vand.u32 2147483647, %v487_v31  ;;  %v886_v61 = vpop.eup %885  ;;  %v404_v54 = vxor.u32 2147483648, %v884_v59  ;;  %v662_v31 = vld [vmem:[%s1331_s3] sm:$0xff] }
  0xfd   :  { %v401_v58 = vxor.u32 2147483648, %v886_v61 }
  0xfe   :  { %v491_v35 = vmul.f32 %v490_v48, %v488_v41  ;;  %v405_v11 = vsel %vm403_vm0, %v404_v54, %v886_v61 }
  0xff   :  { %v402_v63 = vsel %vm400_vm15, %v884_v59, %v401_v58 }
 0x100   :  { %v492_v42 = vxor.u32 2147483648, %v491_v35  ;;  %v406_v55 = vsel %vm399_vm1, %v402_v63, %v405_v11 }
 0x101   :  { %v407_v40 = vsel %vm396_vm2, nan, %v406_v55 }
 0x102   :  { %v493_v27 = vsel %vm410_vm13, %v492_v42, %v491_v35  ;;  %v514_v62 = vmul.f32 %v407_v40, %v407_v40 }
 0x103   :  { %v496_v47 = vsel %vm409_vm14, %v1103_v52, %v493_v27  ;;  %v542_v52 = vld [vmem:[%s1330_s2 + $0x10] sm:$0xff] }
 0x104   :  { %887 = vcosq.f32 %v496_v47  ;;  %v534_v7 = vmul.f32 %v526_v34, %v514_v62 }
 0x105   :  { %889 = vsinq.f32 %v496_v47 }
 0x106   :  { %v538_v23 = vadd.f32 %v534_v7, %v1019_v39  ;;  %v543_v39 = vld [vmem:[%s1330_s2 + $0x18] sm:$0xff] }
 0x10e   :  { %v888_v8 = vpop.eup %887 }
 0x10f   :  { %v890_v45 = vpop.eup %889  ;;  %v508_v46 = vxor.u32 2147483648, %v888_v8 }
 0x110   :  { %v505_v53 = vxor.u32 2147483648, %v890_v45 }
 0x111   :  { %v509_v49 = vsel %vm507_vm3, %v508_v46, %v890_v45 }
 0x112   :  { %v506_v37 = vsel %vm504_vm4, %v888_v8, %v505_v53 }
 0x113   :  { %v510_v1 = vsel %vm503_vm5, %v506_v37, %v509_v49 }
 0x114   :  { %v511_v3 = vsel %vm500_vm6, nan, %v510_v1 }
 0x115   :  { %v515_v9 = vmul.f32 %v511_v3, %v511_v3 }
 0x117   :  { %v535_v44 = vmul.f32 %v530_v36, %v515_v9 }
 0x119   :  { %v539_v15 = vadd.f32 %v535_v44, %v1030_v51  ;;  %v926_v51 = vmov 0.0|0.0  }
 0x11a   :  { %825 = vmatprep.subr.bf16.mxu1 %v926_v51 }
 0x11b   :  { %v821_v10 = vpack.c.bf16 %v539_v15, %v538_v23 }
 0x11d   :  { %822 = vmatprep.subr.bf16.mxu0 %v821_v10 }
 0x11e   :  { %824 = vmatpush3.bf16.msra.mxu0 %v821_v10 }
 0x121   :  { %801 = vmatmul.mubr.msk.f32.vlgmr.msra.gmra.mrb[0].mxu0 %vm560_vm11, %v541_v21 }
 0x122   :  { %803 = vmatprep.mubr.msk.f32.mxu0 %vm560_vm11, %v542_v52 }
 0x125   :  { %804 = vmatmul.mubr.msk.f32.gmra.mrb[2].mxu0 %vm560_vm11, %v543_v39 }
 0x133   :  { %v546_v20 = vpop.permute.xlu1 %545  ;;  %v550_v22 = vpop.permute.xlu0 %549 }
 0x137   :  { %v554_v24 = vpop.permute.xlu1 %553 }
 0x13b   :  { %v558_v0 = vpop.permute.xlu1 %557 }
 0x170   :  { %v667_v41 = vpop.permute.xlu0 %666 }
 0x1f4   :  { %v802_v26 = vpop.f32.mrb[0].mxu0 }
 0x1f5   :  { %v645_v16 = vadd.f32 %v802_v26, %v550_v22  ;;  %v639_v18 = vpop.f32.mrb[1].mxu0 }
 0x1f6   :  { %v640_v13 = vadd.f32 %v639_v18, %v546_v20 }
 0x1f7   :  { %v659_v14 = vmax.f32 %v645_v16, 0.0 }
 0x1f8   :  { %v658_v17 = vmax.f32 %v640_v13, 0.0  ;;  %v805_v50 = vpop.f32.mrb[2].mxu0 }
 0x1f9   :  { %v655_v28 = vadd.f32 %v805_v50, %v558_v0  ;;  %v649_v19 = vpop.f32.mrb[3].mxu0 }
 0x1fa   :  { %v650_v29 = vadd.f32 %v649_v19, %v554_v24  ;;  %v826_v12 = vpack.c.bf16 %v659_v14, %v658_v17 }
 0x1fb   :  { %v661_v56 = vmax.f32 %v655_v28, 0.0 }
 0x1fc   :  { %v660_v30 = vmax.f32 %v650_v29, 0.0  ;;  %827 = vmatpush3.bf16.msra.mxu1 %v826_v12 }
 0x1fd   :  { %828 = vmatprep.subr.bf16.mxu1 %v926_v51 }
 0x1fe   :  { %v829_v2 = vpack.c.bf16 %v661_v56, %v660_v30 }
 0x200   :  { %830 = vmatpush3.bf16.msra.mxu1 %v829_v2 }
 0x203   :  { %815 = vmatmul.mubr.msk.f32.vlgmr.msra.gmra.mrb[0].mxu1 %vm560_vm11, %v662_v31 }
 0x2d6   :  { %v738_v48 = vpop.f32.mrb[0].mxu1 }
 0x2d7   :  { %v739_v32 = vadd.f32 %v738_v48, %v667_v41  ;;  %v816_v35 = vpop.f32.mrb[1].mxu1 }
 0x2d9   :  { %742 = vst [vmem:[#allocation2] sm:$0xff] %v739_v32 }
 0x2da   :  { %902 = shalt.err (!%p899_p4)
}
 0x2db   :  { %s903_s3 = scalar_lea.hbm %s1333_s5, 128 }
 0x2dc   :  { %p904_p5 = scmp.ne.s32.totalorder %s1333_s5, %s903_s3  ;;  %p907_p6 = scmp.lt.u32.totalorder %s903_s3, %s1333_s5 }
 0x2de   :  { %p909_p7 = pnand %p907_p6, %p904_p5 }
 0x2e0   :  { %912 = shalt.err (!%p909_p7)
}
 0x2e1   :  { %752 = dma.vmem_to_hbm [thread:$0]  %s750_s12, 128, %s1333_s5, [#allocation3]  }
 0x2e2   :  { %913 = dma.done.wait [#allocation3], 128  }
 0x2e3   :  { %914 = vsyncadd [#allocation3], 4294967168 }
 0x2e4   :  { %756 = vsyncpa [#allocation3], 1 }

</bundles_post_ra>
